<compile_context>
chip_gen: v7x
topology: tpu7x:2x2x1
jax: 0.10.0
libtpu: 0.0.40
codegen_flags: <defaults>
</compile_context>

<pallas_src>
import functools

import jax
import jax.numpy as jnp
import numpy as np
from jax.experimental import pallas as pl
from jax.experimental.pallas import tpu as pltpu


def _round_up(a, m):
    return ((a + m - 1) // m) * m


# --------------------- Fused Encoder kernel (single pallas_call) ------------ #
def encoder_fused_kernel(gate_x_ref, w_hh_ref, fc_w_ref, fc_b_ref,
                         head_w_ref, head_b_ref, out_ref, h_scratch,
                         *, nb, seq_len):
    """One grid step handles a block of `nb` sequences end-to-end.

    gate_x_ref : (1, T*nb, 4H) precomputed x/c projection (+ bias); rows are
                 ordered t*nb + n (time-major within the block).
    w_hh_ref   : (H, 4H) recurrent weight (transposed, PyTorch i,f,g,o order,
                 g columns pre-scaled by 2).
    fc_w_ref   : (H, H), fc_b_ref: (1, H)
    head_w_ref : (H, OUT) fused [mu | logvar] weight, zero-padded to OUT lanes.
    head_b_ref : (1, OUT)
    out_ref    : (T*nb, OUT) lane-dense output slab for this block.
    h_scratch  : (T*nb, H)   VMEM scratch holding the hidden sequence.
    """
    h_dim = w_hh_ref.shape[0]
    w_hh = w_hh_ref[...]                      # load once, reuse across steps
    gx = gate_x_ref[0]                        # (T*nb, 4H): one dense VMEM load

    h_t = jnp.zeros((nb, h_dim), jnp.float32)     # hidden=None -> zero init
    c_t = jnp.zeros((nb, h_dim), jnp.float32)

    # Fully unrolled static time loop (T is small). Only h_t @ W_hh and the
    # gate nonlinearities sit on the serial dependence chain; the gate_x
    # slices do not depend on h_t and can be scheduled off the critical path.
    # (For very long T, switch to lax.fori_loop + per-step VMEM reads.)
    for t in range(seq_len):
        gates = gx[t * nb:(t + 1) * nb, :] + jnp.dot(
            h_t, w_hh, preferred_element_type=jnp.float32)
        sig = jax.nn.sigmoid(gates)                      # single full-width EUP pass
        i_g = sig[:, 0 * h_dim:1 * h_dim]
        f_g = sig[:, 1 * h_dim:2 * h_dim]
        g_g = 2.0 * sig[:, 2 * h_dim:3 * h_dim] - 1.0    # == tanh(orig g preact)
        o_g = sig[:, 3 * h_dim:4 * h_dim]
        c_t = f_g * c_t + i_g * g_g
        h_t = o_g * jnp.tanh(c_t)
        h_scratch[t * nb:(t + 1) * nb, :] = h_t          # VMEM-only store

    # Fused heads on the whole hidden slab; single lane-dense HBM writeback.
    h_all = h_scratch[...]                               # (T*nb, H)
    fc = jnp.maximum(
        jnp.dot(h_all, fc_w_ref[...], preferred_element_type=jnp.float32)
        + fc_b_ref[...], 0.0)
    out_ref[...] = (jnp.dot(fc, head_w_ref[...],
                            preferred_element_type=jnp.float32)
                    + head_b_ref[...])


# --------------------- One-time parameter preprocessing --------------------- #
def preprocess_params(params, x_dim):
    """Hoisted weight re-layout (done once, not per forward call):
       * fold a x2 scale into the g-gate columns (PyTorch order i,f,g,o) of
         W_ih / W_hh / b so the kernel can use 2*sigmoid(.)-1 instead of a
         second full-width tanh pass,
       * fuse mu/logvar into one head and zero-pad it to a 128-lane multiple
         so the kernel's only HBM store is lane-dense."""
    h_dim = params["w_hh"].shape[0]
    g_scale = jnp.ones((4 * h_dim,), jnp.float32).at[2 * h_dim:3 * h_dim].set(2.0)
    w_ih = params["w_ih"] * g_scale[None, :]

    head_w = jnp.concatenate([params["mu_w"], params["lv_w"]], axis=1)  # (H, 2X)
    head_b = jnp.concatenate([params["mu_b"], params["lv_b"]], axis=1)  # (1, 2X)
    out_w = _round_up(2 * x_dim, 128)
    pad = out_w - head_w.shape[1]
    return {
        "w_ih_x": w_ih[:x_dim],
        "w_ih_c": w_ih[x_dim:],
        "w_hh": params["w_hh"] * g_scale[None, :],
        "b": params["b"] * g_scale[None, :],
        "fc_w": params["fc_w"],
        "fc_b": params["fc_b"],
        "head_w": jnp.pad(head_w, ((0, 0), (0, pad))),
        "head_b": jnp.pad(head_b, ((0, 0), (0, pad))),
    }


# ------------------------------- Wrapper ------------------------------------ #
def encoder_forward(x, c, prep, *, batch_block=None):
    """Fused Pallas forward. `batch_block` (divides N) controls the per-grid-step
    batch block; blocks are independent ("parallel"), so batch_block < N shards
    the recurrence across TensorCores on v7x. Default keeps the whole batch in
    one grid step (best for single-TC v5e/v6e at small N)."""
    n, seq_len, x_dim = x.shape
    h_dim = prep["w_hh"].shape[0]
    g_dim = 4 * h_dim
    out_w = prep["head_w"].shape[1]

    nb = n if batch_block is None else batch_block
    assert n % nb == 0
    num_blocks = n // nb

    # Hoisted input projection (one batched matmul); the conditioning vector's
    # contribution is time-invariant -> folded into a per-sequence bias, so the
    # [x, c] concat is never materialized.
    gate_c = c @ prep["w_ih_c"] + prep["b"]                           # (N, 4H)
    gate_x = jnp.einsum("ntx,xg->ntg", x, prep["w_ih_x"]) + gate_c[:, None, :]
    # Time-major-within-block layout (blocks, T*nb, 4H): trailing dims are a
    # multiple of (8, 128) -> zero sublane/lane padding in VMEM.
    gate_x = (gate_x.reshape(num_blocks, nb, seq_len, g_dim)
                    .transpose(0, 2, 1, 3)
                    .reshape(num_blocks, seq_len * nb, g_dim)
                    .astype(jnp.float32))

    kernel = functools.partial(encoder_fused_kernel, nb=nb, seq_len=seq_len)
    out = pl.pallas_call(
        kernel,
        out_shape=jax.ShapeDtypeStruct((num_blocks * seq_len * nb, out_w),
                                       jnp.float32),
        grid_spec=pltpu.PrefetchScalarGridSpec(
            num_scalar_prefetch=0,
            grid=(num_blocks,),
            in_specs=[
                pl.BlockSpec((1, seq_len * nb, g_dim), lambda b: (b, 0, 0)),
                pl.BlockSpec((h_dim, g_dim), lambda b: (0, 0)),     # W_hh^T
                pl.BlockSpec((h_dim, h_dim), lambda b: (0, 0)),     # fc W^T
                pl.BlockSpec((1, h_dim), lambda b: (0, 0)),         # fc b
                pl.BlockSpec((h_dim, out_w), lambda b: (0, 0)),     # [mu|lv] W^T
                pl.BlockSpec((1, out_w), lambda b: (0, 0)),         # [mu|lv] b
            ],
            out_specs=pl.BlockSpec((seq_len * nb, out_w), lambda b: (b, 0)),
            scratch_shapes=[pltpu.VMEM((seq_len * nb, h_dim), jnp.float32)],
        ),
        compiler_params=pltpu.CompilerParams(
            dimension_semantics=("parallel",)),          # blocks are independent
    )(gate_x, prep["w_hh"], prep["fc_w"], prep["fc_b"],
      prep["head_w"], prep["head_b"])

    # Un-block / un-time-major the tiny output slab and slice mu / logvar.
    out = (out.reshape(num_blocks, seq_len, nb, out_w)
              .transpose(0, 2, 1, 3)
              .reshape(n, seq_len, out_w))
    return out[..., :x_dim], out[..., x_dim:2 * x_dim]


# ---------------------- Pure-JAX reference (lax.scan) ----------------------- #
def encoder_ref(x, c, params):
    n, t, x_dim = x.shape
    h_dim = params["fc_w"].shape[0]
    c_exp = jnp.broadcast_to(c[:, None, :], (n, t, c.shape[-1]))
    xc = jnp.concatenate([x, c_exp], axis=2)
    xc_tm = jnp.transpose(xc, (1, 0, 2))

    def step(carry, x_t):
        h_prev, c_prev = carry
        gates = x_t @ params["w_ih"] + h_prev @ params["w_hh"] + params["b"]
        H = h_dim
        i_g = jax.nn.sigmoid(gates[:, 0 * H:1 * H])
        f_g = jax.nn.sigmoid(gates[:, 1 * H:2 * H])
        g_g = jnp.tanh(gates[:, 2 * H:3 * H])
        o_g = jax.nn.sigmoid(gates[:, 3 * H:4 * H])
        c_new = f_g * c_prev + i_g * g_g
        h_new = o_g * jnp.tanh(c_new)
        return (h_new, c_new), h_new

    init = (jnp.zeros((n, h_dim), jnp.float32), jnp.zeros((n, h_dim), jnp.float32))
    _, h_seq = jax.lax.scan(step, init, xc_tm)            # (T, N, H)
    fc = jnp.maximum(h_seq @ params["fc_w"] + params["fc_b"], 0.0)
    mu = fc @ params["mu_w"] + params["mu_b"]
    lv = fc @ params["lv_w"] + params["lv_b"]
    return jnp.transpose(mu, (1, 0, 2)), jnp.transpose(lv, (1, 0, 2))


# ------------------------------- Main --------------------------------------- #
if __name__ == "__main__":
    # Small shapes consistent with Encoder(x_dim, h_dim, c_dim).
    x_dim, h_dim, c_dim = 4, 32, 3
    N, T = 2, 8
    in_dim = x_dim + c_dim

    key = jax.random.PRNGKey(0)
    keys = jax.random.split(key, 12)
    scale = 0.2

    # PyTorch LSTM weights are (4H, in) / (4H, H); store transposed for x @ W.
    params = {
        "w_ih": scale * jax.random.normal(keys[0], (in_dim, 4 * h_dim), jnp.float32),
        "w_hh": scale * jax.random.normal(keys[1], (h_dim, 4 * h_dim), jnp.float32),
        "b": (scale * jax.random.normal(keys[2], (1, 4 * h_dim), jnp.float32)
              + scale * jax.random.normal(keys[3], (1, 4 * h_dim), jnp.float32)),
        "fc_w": scale * jax.random.normal(keys[4], (h_dim, h_dim), jnp.float32),
        "fc_b": scale * jax.random.normal(keys[5], (1, h_dim), jnp.float32),
        "mu_w": scale * jax.random.normal(keys[6], (h_dim, x_dim), jnp.float32),
        "mu_b": scale * jax.random.normal(keys[7], (1, x_dim), jnp.float32),
        "lv_w": scale * jax.random.normal(keys[8], (h_dim, x_dim), jnp.float32),
        "lv_b": scale * jax.random.normal(keys[9], (1, x_dim), jnp.float32),
    }

    x = jax.random.normal(keys[10], (N, T, x_dim), jnp.float32)
    c = jax.random.normal(keys[11], (N, c_dim), jnp.float32)

    prep = preprocess_params(params, x_dim)           # one-time weight re-layout
    mu, logvar = encoder_forward(x, c, prep)
    jax.block_until_ready((mu, logvar))

    mu_ref, lv_ref = encoder_ref(x, c, params)
    np.testing.assert_allclose(np.asarray(mu), np.asarray(mu_ref), rtol=1e-4, atol=1e-4)
    np.testing.assert_allclose(np.asarray(logvar), np.asarray(lv_ref), rtol=1e-4, atol=1e-4)

    print("KERNEL_OK")
</pallas_src>

<mosaic_0001>
module attributes {stable_mosaic.version = 11 : i64} {
  func.func @encoder_fused_kernel(%arg0: i32, %arg1: memref<1x16x128xf32, #tpu.memory_space<vmem>>, %arg2: memref<32x128xf32, #tpu.memory_space<vmem>>, %arg3: memref<32x32xf32, #tpu.memory_space<vmem>>, %arg4: memref<1x32xf32, #tpu.memory_space<vmem>>, %arg5: memref<32x128xf32, #tpu.memory_space<vmem>>, %arg6: memref<1x128xf32, #tpu.memory_space<vmem>>, %arg7: memref<16x128xf32, #tpu.memory_space<vmem>>, %arg8: memref<16x32xf32, #tpu.memory_space<vmem>>) attributes {dimension_semantics = [#tpu.dimension_semantics<parallel>], iteration_bounds = array<i64: 1>, scalar_prefetch = 0 : i64, scratch_operands = 1 : i64, tpu.core_type = #tpu.core_type<tc>, window_params = [{transform_indices = @transform_0, window_bounds = array<i64: 1, 16, 128>}, {pipeline_mode = #tpu.pipeline_mode<synchronous>, transform_indices = @transform_1, window_bounds = array<i64: 32, 128>}, {pipeline_mode = #tpu.pipeline_mode<synchronous>, transform_indices = @transform_2, window_bounds = array<i64: 32, 32>}, {pipeline_mode = #tpu.pipeline_mode<synchronous>, transform_indices = @transform_3, window_bounds = array<i64: 1, 32>}, {pipeline_mode = #tpu.pipeline_mode<synchronous>, transform_indices = @transform_4, window_bounds = array<i64: 32, 128>}, {pipeline_mode = #tpu.pipeline_mode<synchronous>, transform_indices = @transform_5, window_bounds = array<i64: 1, 128>}, {transform_indices = @transform_6, window_bounds = array<i64: 16, 128>}]} {
    %c0 = arith.constant 0 : index
    %c0_0 = arith.constant 0 : index
    %0 = vector.load %arg2[%c0, %c0_0] : memref<32x128xf32, #tpu.memory_space<vmem>>, vector<32x128xf32>
    %c0_1 = arith.constant 0 : index
    %c0_2 = arith.constant 0 : index
    %c0_3 = arith.constant 0 : index
    %1 = vector.load %arg1[%c0_1, %c0_2, %c0_3] : memref<1x16x128xf32, #tpu.memory_space<vmem>>, vector<1x16x128xf32>
    %2 = vector.shape_cast %1 : vector<1x16x128xf32> to vector<16x128xf32>
    %cst = arith.constant 0.000000e+00 : f32
    %3 = vector.broadcast %cst : f32 to vector<2x32xf32>
    %cst_4 = arith.constant 0.000000e+00 : f32
    %4 = vector.broadcast %cst_4 : f32 to vector<2x32xf32>
    %5 = vector.extract_strided_slice %2 {offsets = [0, 0], sizes = [2, 128], strides = [1, 1]} : vector<16x128xf32> to vector<2x128xf32>
    %cst_5 = arith.constant dense<0.000000e+00> : vector<2x128xf32>
    %6 = tpu.matmul %3, %0, %cst_5 {dimension_numbers = #tpu.dot_dimension_numbers<[1], [0], [0], [1], [0, 0, 1, 1], [], []>} : vector<2x32xf32>, vector<32x128xf32>, vector<2x128xf32> -> vector<2x128xf32>
    %7 = arith.addf %5, %6 : vector<2x128xf32>
    %8 = arith.negf %7 : vector<2x128xf32>
    %9 = math.exp %8 : vector<2x128xf32>
    %cst_6 = arith.constant 1.000000e+00 : f32
    %10 = vector.broadcast %cst_6 : f32 to vector<2x128xf32>
    %11 = arith.addf %10, %9 : vector<2x128xf32>
    %12 = arith.divf %10, %11 : vector<2x128xf32>
    %13 = vector.extract_strided_slice %12 {offsets = [0, 0], sizes = [2, 32], strides = [1, 1]} : vector<2x128xf32> to vector<2x32xf32>
    %14 = vector.extract_strided_slice %12 {offsets = [0, 32], sizes = [2, 32], strides = [1, 1]} : vector<2x128xf32> to vector<2x32xf32>
    %15 = vector.extract_strided_slice %12 {offsets = [0, 64], sizes = [2, 32], strides = [1, 1]} : vector<2x128xf32> to vector<2x32xf32>
    %cst_7 = arith.constant 2.000000e+00 : f32
    %16 = vector.broadcast %cst_7 : f32 to vector<2x32xf32>
    %17 = arith.mulf %16, %15 : vector<2x32xf32>
    %cst_8 = arith.constant 1.000000e+00 : f32
    %18 = vector.broadcast %cst_8 : f32 to vector<2x32xf32>
    %19 = arith.subf %17, %18 : vector<2x32xf32>
    %20 = vector.extract_strided_slice %12 {offsets = [0, 96], sizes = [2, 32], strides = [1, 1]} : vector<2x128xf32> to vector<2x32xf32>
    %21 = arith.mulf %14, %4 : vector<2x32xf32>
    %22 = arith.mulf %13, %19 : vector<2x32xf32>
    %23 = arith.addf %21, %22 : vector<2x32xf32>
    %24 = math.tanh %23 : vector<2x32xf32>
    %25 = arith.mulf %20, %24 : vector<2x32xf32>
    %c0_9 = arith.constant 0 : index
    %c0_10 = arith.constant 0 : index
    %26 = vector.load %arg8[%c0_9, %c0_10] : memref<16x32xf32, #tpu.memory_space<vmem>>, vector<2x32xf32>
    tpu.vector_store %arg8[%c0_9, %c0_10], %25 {strides = array<i32>} : memref<16x32xf32, #tpu.memory_space<vmem>>, vector<2x32xf32>,
    %27 = vector.extract_strided_slice %2 {offsets = [2, 0], sizes = [2, 128], strides = [1, 1]} : vector<16x128xf32> to vector<2x128xf32>
    %cst_11 = arith.constant dense<0.000000e+00> : vector<2x128xf32>
    %28 = tpu.matmul %25, %0, %cst_11 {dimension_numbers = #tpu.dot_dimension_numbers<[1], [0], [0], [1], [0, 0, 1, 1], [], []>} : vector<2x32xf32>, vector<32x128xf32>, vector<2x128xf32> -> vector<2x128xf32>
    %29 = arith.addf %27, %28 : vector<2x128xf32>
    %30 = arith.negf %29 : vector<2x128xf32>
    %31 = math.exp %30 : vector<2x128xf32>
    %cst_12 = arith.constant 1.000000e+00 : f32
    %32 = vector.broadcast %cst_12 : f32 to vector<2x128xf32>
    %33 = arith.addf %32, %31 : vector<2x128xf32>
    %34 = arith.divf %32, %33 : vector<2x128xf32>
    %35 = vector.extract_strided_slice %34 {offsets = [0, 0], sizes = [2, 32], strides = [1, 1]} : vector<2x128xf32> to vector<2x32xf32>
    %36 = vector.extract_strided_slice %34 {offsets = [0, 32], sizes = [2, 32], strides = [1, 1]} : vector<2x128xf32> to vector<2x32xf32>
    %37 = vector.extract_strided_slice %34 {offsets = [0, 64], sizes = [2, 32], strides = [1, 1]} : vector<2x128xf32> to vector<2x32xf32>
    %cst_13 = arith.constant 2.000000e+00 : f32
    %38 = vector.broadcast %cst_13 : f32 to vector<2x32xf32>
    %39 = arith.mulf %38, %37 : vector<2x32xf32>
    %cst_14 = arith.constant 1.000000e+00 : f32
    %40 = vector.broadcast %cst_14 : f32 to vector<2x32xf32>
    %41 = arith.subf %39, %40 : vector<2x32xf32>
    %42 = vector.extract_strided_slice %34 {offsets = [0, 96], sizes = [2, 32], strides = [1, 1]} : vector<2x128xf32> to vector<2x32xf32>
    %43 = arith.mulf %36, %23 : vector<2x32xf32>
    %44 = arith.mulf %35, %41 : vector<2x32xf32>
    %45 = arith.addf %43, %44 : vector<2x32xf32>
    %46 = math.tanh %45 : vector<2x32xf32>
    %47 = arith.mulf %42, %46 : vector<2x32xf32>
    %c2 = arith.constant 2 : index
    %c0_15 = arith.constant 0 : index
    %48 = vector.load %arg8[%c2, %c0_15] : memref<16x32xf32, #tpu.memory_space<vmem>>, vector<2x32xf32>
    tpu.vector_store %arg8[%c2, %c0_15], %47 {strides = array<i32>} : memref<16x32xf32, #tpu.memory_space<vmem>>, vector<2x32xf32>,
    %49 = vector.extract_strided_slice %2 {offsets = [4, 0], sizes = [2, 128], strides = [1, 1]} : vector<16x128xf32> to vector<2x128xf32>
    %cst_16 = arith.constant dense<0.000000e+00> : vector<2x128xf32>
    %50 = tpu.matmul %47, %0, %cst_16 {dimension_numbers = #tpu.dot_dimension_numbers<[1], [0], [0], [1], [0, 0, 1, 1], [], []>} : vector<2x32xf32>, vector<32x128xf32>, vector<2x128xf32> -> vector<2x128xf32>
    %51 = arith.addf %49, %50 : vector<2x128xf32>
    %52 = arith.negf %51 : vector<2x128xf32>
    %53 = math.exp %52 : vector<2x128xf32>
    %cst_17 = arith.constant 1.000000e+00 : f32
    %54 = vector.broadcast %cst_17 : f32 to vector<2x128xf32>
    %55 = arith.addf %54, %53 : vector<2x128xf32>
    %56 = arith.divf %54, %55 : vector<2x128xf32>
    %57 = vector.extract_strided_slice %56 {offsets = [0, 0], sizes = [2, 32], strides = [1, 1]} : vector<2x128xf32> to vector<2x32xf32>
    %58 = vector.extract_strided_slice %56 {offsets = [0, 32], sizes = [2, 32], strides = [1, 1]} : vector<2x128xf32> to vector<2x32xf32>
    %59 = vector.extract_strided_slice %56 {offsets = [0, 64], sizes = [2, 32], strides = [1, 1]} : vector<2x128xf32> to vector<2x32xf32>
    %cst_18 = arith.constant 2.000000e+00 : f32
    %60 = vector.broadcast %cst_18 : f32 to vector<2x32xf32>
    %61 = arith.mulf %60, %59 : vector<2x32xf32>
    %cst_19 = arith.constant 1.000000e+00 : f32
    %62 = vector.broadcast %cst_19 : f32 to vector<2x32xf32>
    %63 = arith.subf %61, %62 : vector<2x32xf32>
    %64 = vector.extract_strided_slice %56 {offsets = [0, 96], sizes = [2, 32], strides = [1, 1]} : vector<2x128xf32> to vector<2x32xf32>
    %65 = arith.mulf %58, %45 : vector<2x32xf32>
    %66 = arith.mulf %57, %63 : vector<2x32xf32>
    %67 = arith.addf %65, %66 : vector<2x32xf32>
    %68 = math.tanh %67 : vector<2x32xf32>
    %69 = arith.mulf %64, %68 : vector<2x32xf32>
    %c4 = arith.constant 4 : index
    %c0_20 = arith.constant 0 : index
    %70 = vector.load %arg8[%c4, %c0_20] : memref<16x32xf32, #tpu.memory_space<vmem>>, vector<2x32xf32>
    tpu.vector_store %arg8[%c4, %c0_20], %69 {strides = array<i32>} : memref<16x32xf32, #tpu.memory_space<vmem>>, vector<2x32xf32>,
    %71 = vector.extract_strided_slice %2 {offsets = [6, 0], sizes = [2, 128], strides = [1, 1]} : vector<16x128xf32> to vector<2x128xf32>
    %cst_21 = arith.constant dense<0.000000e+00> : vector<2x128xf32>
    %72 = tpu.matmul %69, %0, %cst_21 {dimension_numbers = #tpu.dot_dimension_numbers<[1], [0], [0], [1], [0, 0, 1, 1], [], []>} : vector<2x32xf32>, vector<32x128xf32>, vector<2x128xf32> -> vector<2x128xf32>
    %73 = arith.addf %71, %72 : vector<2x128xf32>
    %74 = arith.negf %73 : vector<2x128xf32>
    %75 = math.exp %74 : vector<2x128xf32>
    %cst_22 = arith.constant 1.000000e+00 : f32
    %76 = vector.broadcast %cst_22 : f32 to vector<2x128xf32>
    %77 = arith.addf %76, %75 : vector<2x128xf32>
    %78 = arith.divf %76, %77 : vector<2x128xf32>
    %79 = vector.extract_strided_slice %78 {offsets = [0, 0], sizes = [2, 32], strides = [1, 1]} : vector<2x128xf32> to vector<2x32xf32>
    %80 = vector.extract_strided_slice %78 {offsets = [0, 32], sizes = [2, 32], strides = [1, 1]} : vector<2x128xf32> to vector<2x32xf32>
    %81 = vector.extract_strided_slice %78 {offsets = [0, 64], sizes = [2, 32], strides = [1, 1]} : vector<2x128xf32> to vector<2x32xf32>
    %cst_23 = arith.constant 2.000000e+00 : f32
    %82 = vector.broadcast %cst_23 : f32 to vector<2x32xf32>
    %83 = arith.mulf %82, %81 : vector<2x32xf32>
    %cst_24 = arith.constant 1.000000e+00 : f32
    %84 = vector.broadcast %cst_24 : f32 to vector<2x32xf32>
    %85 = arith.subf %83, %84 : vector<2x32xf32>
    %86 = vector.extract_strided_slice %78 {offsets = [0, 96], sizes = [2, 32], strides = [1, 1]} : vector<2x128xf32> to vector<2x32xf32>
    %87 = arith.mulf %80, %67 : vector<2x32xf32>
    %88 = arith.mulf %79, %85 : vector<2x32xf32>
    %89 = arith.addf %87, %88 : vector<2x32xf32>
    %90 = math.tanh %89 : vector<2x32xf32>
    %91 = arith.mulf %86, %90 : vector<2x32xf32>
    %c6 = arith.constant 6 : index
    %c0_25 = arith.constant 0 : index
    %92 = vector.load %arg8[%c6, %c0_25] : memref<16x32xf32, #tpu.memory_space<vmem>>, vector<2x32xf32>
    tpu.vector_store %arg8[%c6, %c0_25], %91 {strides = array<i32>} : memref<16x32xf32, #tpu.memory_space<vmem>>, vector<2x32xf32>,
    %93 = vector.extract_strided_slice %2 {offsets = [8, 0], sizes = [2, 128], strides = [1, 1]} : vector<16x128xf32> to vector<2x128xf32>
    %cst_26 = arith.constant dense<0.000000e+00> : vector<2x128xf32>
    %94 = tpu.matmul %91, %0, %cst_26 {dimension_numbers = #tpu.dot_dimension_numbers<[1], [0], [0], [1], [0, 0, 1, 1], [], []>} : vector<2x32xf32>, vector<32x128xf32>, vector<2x128xf32> -> vector<2x128xf32>
    %95 = arith.addf %93, %94 : vector<2x128xf32>
    %96 = arith.negf %95 : vector<2x128xf32>
    %97 = math.exp %96 : vector<2x128xf32>
    %cst_27 = arith.constant 1.000000e+00 : f32
    %98 = vector.broadcast %cst_27 : f32 to vector<2x128xf32>
    %99 = arith.addf %98, %97 : vector<2x128xf32>
    %100 = arith.divf %98, %99 : vector<2x128xf32>
    %101 = vector.extract_strided_slice %100 {offsets = [0, 0], sizes = [2, 32], strides = [1, 1]} : vector<2x128xf32> to vector<2x32xf32>
    %102 = vector.extract_strided_slice %100 {offsets = [0, 32], sizes = [2, 32], strides = [1, 1]} : vector<2x128xf32> to vector<2x32xf32>
    %103 = vector.extract_strided_slice %100 {offsets = [0, 64], sizes = [2, 32], strides = [1, 1]} : vector<2x128xf32> to vector<2x32xf32>
    %cst_28 = arith.constant 2.000000e+00 : f32
    %104 = vector.broadcast %cst_28 : f32 to vector<2x32xf32>
    %105 = arith.mulf %104, %103 : vector<2x32xf32>
    %cst_29 = arith.constant 1.000000e+00 : f32
    %106 = vector.broadcast %cst_29 : f32 to vector<2x32xf32>
    %107 = arith.subf %105, %106 : vector<2x32xf32>
    %108 = vector.extract_strided_slice %100 {offsets = [0, 96], sizes = [2, 32], strides = [1, 1]} : vector<2x128xf32> to vector<2x32xf32>
    %109 = arith.mulf %102, %89 : vector<2x32xf32>
    %110 = arith.mulf %101, %107 : vector<2x32xf32>
    %111 = arith.addf %109, %110 : vector<2x32xf32>
    %112 = math.tanh %111 : vector<2x32xf32>
    %113 = arith.mulf %108, %112 : vector<2x32xf32>
    %c8 = arith.constant 8 : index
    %c0_30 = arith.constant 0 : index
    %114 = vector.load %arg8[%c8, %c0_30] : memref<16x32xf32, #tpu.memory_space<vmem>>, vector<2x32xf32>
    tpu.vector_store %arg8[%c8, %c0_30], %113 {strides = array<i32>} : memref<16x32xf32, #tpu.memory_space<vmem>>, vector<2x32xf32>,
    %115 = vector.extract_strided_slice %2 {offsets = [10, 0], sizes = [2, 128], strides = [1, 1]} : vector<16x128xf32> to vector<2x128xf32>
    %cst_31 = arith.constant dense<0.000000e+00> : vector<2x128xf32>
    %116 = tpu.matmul %113, %0, %cst_31 {dimension_numbers = #tpu.dot_dimension_numbers<[1], [0], [0], [1], [0, 0, 1, 1], [], []>} : vector<2x32xf32>, vector<32x128xf32>, vector<2x128xf32> -> vector<2x128xf32>
    %117 = arith.addf %115, %116 : vector<2x128xf32>
    %118 = arith.negf %117 : vector<2x128xf32>
    %119 = math.exp %118 : vector<2x128xf32>
    %cst_32 = arith.constant 1.000000e+00 : f32
    %120 = vector.broadcast %cst_32 : f32 to vector<2x128xf32>
    %121 = arith.addf %120, %119 : vector<2x128xf32>
    %122 = arith.divf %120, %121 : vector<2x128xf32>
    %123 = vector.extract_strided_slice %122 {offsets = [0, 0], sizes = [2, 32], strides = [1, 1]} : vector<2x128xf32> to vector<2x32xf32>
    %124 = vector.extract_strided_slice %122 {offsets = [0, 32], sizes = [2, 32], strides = [1, 1]} : vector<2x128xf32> to vector<2x32xf32>
    %125 = vector.extract_strided_slice %122 {offsets = [0, 64], sizes = [2, 32], strides = [1, 1]} : vector<2x128xf32> to vector<2x32xf32>
    %cst_33 = arith.constant 2.000000e+00 : f32
    %126 = vector.broadcast %cst_33 : f32 to vector<2x32xf32>
    %127 = arith.mulf %126, %125 : vector<2x32xf32>
    %cst_34 = arith.constant 1.000000e+00 : f32
    %128 = vector.broadcast %cst_34 : f32 to vector<2x32xf32>
    %129 = arith.subf %127, %128 : vector<2x32xf32>
    %130 = vector.extract_strided_slice %122 {offsets = [0, 96], sizes = [2, 32], strides = [1, 1]} : vector<2x128xf32> to vector<2x32xf32>
    %131 = arith.mulf %124, %111 : vector<2x32xf32>
    %132 = arith.mulf %123, %129 : vector<2x32xf32>
    %133 = arith.addf %131, %132 : vector<2x32xf32>
    %134 = math.tanh %133 : vector<2x32xf32>
    %135 = arith.mulf %130, %134 : vector<2x32xf32>
    %c10 = arith.constant 10 : index
    %c0_35 = arith.constant 0 : index
    %136 = vector.load %arg8[%c10, %c0_35] : memref<16x32xf32, #tpu.memory_space<vmem>>, vector<2x32xf32>
    tpu.vector_store %arg8[%c10, %c0_35], %135 {strides = array<i32>} : memref<16x32xf32, #tpu.memory_space<vmem>>, vector<2x32xf32>,
    %137 = vector.extract_strided_slice %2 {offsets = [12, 0], sizes = [2, 128], strides = [1, 1]} : vector<16x128xf32> to vector<2x128xf32>
    %cst_36 = arith.constant dense<0.000000e+00> : vector<2x128xf32>
    %138 = tpu.matmul %135, %0, %cst_36 {dimension_numbers = #tpu.dot_dimension_numbers<[1], [0], [0], [1], [0, 0, 1, 1], [], []>} : vector<2x32xf32>, vector<32x128xf32>, vector<2x128xf32> -> vector<2x128xf32>
    %139 = arith.addf %137, %138 : vector<2x128xf32>
    %140 = arith.negf %139 : vector<2x128xf32>
    %141 = math.exp %140 : vector<2x128xf32>
    %cst_37 = arith.constant 1.000000e+00 : f32
    %142 = vector.broadcast %cst_37 : f32 to vector<2x128xf32>
    %143 = arith.addf %142, %141 : vector<2x128xf32>
    %144 = arith.divf %142, %143 : vector<2x128xf32>
    %145 = vector.extract_strided_slice %144 {offsets = [0, 0], sizes = [2, 32], strides = [1, 1]} : vector<2x128xf32> to vector<2x32xf32>
    %146 = vector.extract_strided_slice %144 {offsets = [0, 32], sizes = [2, 32], strides = [1, 1]} : vector<2x128xf32> to vector<2x32xf32>
    %147 = vector.extract_strided_slice %144 {offsets = [0, 64], sizes = [2, 32], strides = [1, 1]} : vector<2x128xf32> to vector<2x32xf32>
    %cst_38 = arith.constant 2.000000e+00 : f32
    %148 = vector.broadcast %cst_38 : f32 to vector<2x32xf32>
    %149 = arith.mulf %148, %147 : vector<2x32xf32>
    %cst_39 = arith.constant 1.000000e+00 : f32
    %150 = vector.broadcast %cst_39 : f32 to vector<2x32xf32>
    %151 = arith.subf %149, %150 : vector<2x32xf32>
    %152 = vector.extract_strided_slice %144 {offsets = [0, 96], sizes = [2, 32], strides = [1, 1]} : vector<2x128xf32> to vector<2x32xf32>
    %153 = arith.mulf %146, %133 : vector<2x32xf32>
    %154 = arith.mulf %145, %151 : vector<2x32xf32>
    %155 = arith.addf %153, %154 : vector<2x32xf32>
    %156 = math.tanh %155 : vector<2x32xf32>
    %157 = arith.mulf %152, %156 : vector<2x32xf32>
    %c12 = arith.constant 12 : index
    %c0_40 = arith.constant 0 : index
    %158 = vector.load %arg8[%c12, %c0_40] : memref<16x32xf32, #tpu.memory_space<vmem>>, vector<2x32xf32>
    tpu.vector_store %arg8[%c12, %c0_40], %157 {strides = array<i32>} : memref<16x32xf32, #tpu.memory_space<vmem>>, vector<2x32xf32>,
    %159 = vector.extract_strided_slice %2 {offsets = [14, 0], sizes = [2, 128], strides = [1, 1]} : vector<16x128xf32> to vector<2x128xf32>
    %cst_41 = arith.constant dense<0.000000e+00> : vector<2x128xf32>
    %160 = tpu.matmul %157, %0, %cst_41 {dimension_numbers = #tpu.dot_dimension_numbers<[1], [0], [0], [1], [0, 0, 1, 1], [], []>} : vector<2x32xf32>, vector<32x128xf32>, vector<2x128xf32> -> vector<2x128xf32>
    %161 = arith.addf %159, %160 : vector<2x128xf32>
    %162 = arith.negf %161 : vector<2x128xf32>
    %163 = math.exp %162 : vector<2x128xf32>
    %cst_42 = arith.constant 1.000000e+00 : f32
    %164 = vector.broadcast %cst_42 : f32 to vector<2x128xf32>
    %165 = arith.addf %164, %163 : vector<2x128xf32>
    %166 = arith.divf %164, %165 : vector<2x128xf32>
    %167 = vector.extract_strided_slice %166 {offsets = [0, 0], sizes = [2, 32], strides = [1, 1]} : vector<2x128xf32> to vector<2x32xf32>
    %168 = vector.extract_strided_slice %166 {offsets = [0, 32], sizes = [2, 32], strides = [1, 1]} : vector<2x128xf32> to vector<2x32xf32>
    %169 = vector.extract_strided_slice %166 {offsets = [0, 64], sizes = [2, 32], strides = [1, 1]} : vector<2x128xf32> to vector<2x32xf32>
    %cst_43 = arith.constant 2.000000e+00 : f32
    %170 = vector.broadcast %cst_43 : f32 to vector<2x32xf32>
    %171 = arith.mulf %170, %169 : vector<2x32xf32>
    %cst_44 = arith.constant 1.000000e+00 : f32
    %172 = vector.broadcast %cst_44 : f32 to vector<2x32xf32>
    %173 = arith.subf %171, %172 : vector<2x32xf32>
    %174 = vector.extract_strided_slice %166 {offsets = [0, 96], sizes = [2, 32], strides = [1, 1]} : vector<2x128xf32> to vector<2x32xf32>
    %175 = arith.mulf %168, %155 : vector<2x32xf32>
    %176 = arith.mulf %167, %173 : vector<2x32xf32>
    %177 = arith.addf %175, %176 : vector<2x32xf32>
    %178 = math.tanh %177 : vector<2x32xf32>
    %179 = arith.mulf %174, %178 : vector<2x32xf32>
    %c14 = arith.constant 14 : index
    %c0_45 = arith.constant 0 : index
    %180 = vector.load %arg8[%c14, %c0_45] : memref<16x32xf32, #tpu.memory_space<vmem>>, vector<2x32xf32>
    tpu.vector_store %arg8[%c14, %c0_45], %179 {strides = array<i32>} : memref<16x32xf32, #tpu.memory_space<vmem>>, vector<2x32xf32>,
    %c0_46 = arith.constant 0 : index
    %c0_47 = arith.constant 0 : index
    %181 = vector.load %arg8[%c0_46, %c0_47] : memref<16x32xf32, #tpu.memory_space<vmem>>, vector<16x32xf32>
    %c0_48 = arith.constant 0 : index
    %c0_49 = arith.constant 0 : index
    %182 = vector.load %arg3[%c0_48, %c0_49] : memref<32x32xf32, #tpu.memory_space<vmem>>, vector<32x32xf32>
    %cst_50 = arith.constant dense<0.000000e+00> : vector<16x32xf32>
    %183 = tpu.matmul %181, %182, %cst_50 {dimension_numbers = #tpu.dot_dimension_numbers<[1], [0], [0], [1], [0, 0, 1, 1], [], []>} : vector<16x32xf32>, vector<32x32xf32>, vector<16x32xf32> -> vector<16x32xf32>
    %c0_51 = arith.constant 0 : index
    %c0_52 = arith.constant 0 : index
    %184 = vector.load %arg4[%c0_51, %c0_52] : memref<1x32xf32, #tpu.memory_space<vmem>>, vector<1x32xf32>
    %185 = vector.broadcast %184 : vector<1x32xf32> to vector<16x32xf32>
    %186 = arith.addf %183, %185 : vector<16x32xf32>
    %cst_53 = arith.constant 0.000000e+00 : f32
    %187 = vector.broadcast %cst_53 : f32 to vector<16x32xf32>
    %188 = arith.maximumf %186, %187 : vector<16x32xf32>
    %c0_54 = arith.constant 0 : index
    %c0_55 = arith.constant 0 : index
    %189 = vector.load %arg5[%c0_54, %c0_55] : memref<32x128xf32, #tpu.memory_space<vmem>>, vector<32x128xf32>
    %cst_56 = arith.constant dense<0.000000e+00> : vector<16x128xf32>
    %190 = tpu.matmul %188, %189, %cst_56 {dimension_numbers = #tpu.dot_dimension_numbers<[1], [0], [0], [1], [0, 0, 1, 1], [], []>} : vector<16x32xf32>, vector<32x128xf32>, vector<16x128xf32> -> vector<16x128xf32>
    %c0_57 = arith.constant 0 : index
    %c0_58 = arith.constant 0 : index
    %191 = vector.load %arg6[%c0_57, %c0_58] : memref<1x128xf32, #tpu.memory_space<vmem>>, vector<1x128xf32>
    %192 = vector.broadcast %191 : vector<1x128xf32> to vector<16x128xf32>
    %193 = arith.addf %190, %192 : vector<16x128xf32>
    %c0_59 = arith.constant 0 : index
    %c0_60 = arith.constant 0 : index
    %194 = vector.load %arg7[%c0_59, %c0_60] : memref<16x128xf32, #tpu.memory_space<vmem>>, vector<16x128xf32>
    tpu.vector_store %arg7[%c0_59, %c0_60], %193 {strides = array<i32>} : memref<16x128xf32, #tpu.memory_space<vmem>>, vector<16x128xf32>,
    return
  }
  func.func @transform_0(%arg0: i32) -> (i32, i32, i32) {
    %c0_i32 = arith.constant 0 : i32
    %c0_i32_0 = arith.constant 0 : i32
    %c0_i32_1 = arith.constant 0 : i32
    return %arg0, %c0_i32, %c0_i32_0 : i32, i32, i32
  }
  func.func @transform_1(%arg0: i32) -> (i32, i32) {
    %c0_i32 = arith.constant 0 : i32
    %c0_i32_0 = arith.constant 0 : i32
    %c0_i32_1 = arith.constant 0 : i32
    return %c0_i32, %c0_i32_0 : i32, i32
  }
  func.func @transform_2(%arg0: i32) -> (i32, i32) {
    %c0_i32 = arith.constant 0 : i32
    %c0_i32_0 = arith.constant 0 : i32
    %c0_i32_1 = arith.constant 0 : i32
    return %c0_i32, %c0_i32_0 : i32, i32
  }
  func.func @transform_3(%arg0: i32) -> (i32, i32) {
    %c0_i32 = arith.constant 0 : i32
    %c0_i32_0 = arith.constant 0 : i32
    %c0_i32_1 = arith.constant 0 : i32
    return %c0_i32, %c0_i32_0 : i32, i32
  }
  func.func @transform_4(%arg0: i32) -> (i32, i32) {
    %c0_i32 = arith.constant 0 : i32
    %c0_i32_0 = arith.constant 0 : i32
    %c0_i32_1 = arith.constant 0 : i32
    return %c0_i32, %c0_i32_0 : i32, i32
  }
  func.func @transform_5(%arg0: i32) -> (i32, i32) {
    %c0_i32 = arith.constant 0 : i32
    %c0_i32_0 = arith.constant 0 : i32
    %c0_i32_1 = arith.constant 0 : i32
    return %c0_i32, %c0_i32_0 : i32, i32
  }
  func.func @transform_6(%arg0: i32) -> (i32, i32) {
    %c0_i32 = arith.constant 0 : i32
    %c0_i32_0 = arith.constant 0 : i32
    return %arg0, %c0_i32 : i32, i32
  }
}

</mosaic_0001>

<bundles_post_ra>
// kernel: tpu_custom_call.1
= control target key start
LH: loop header
LB: loop body
LE: loop exit
PB: predicated region body
PF: predicated region fallthrough
CT: control target
= control target key end

     0   :  { %11 = vsyncpa [#allocation4], 0  ;;  %s1890_s0 = inlined_call_operand.hbm [shape: f32[1,16,128], index: 0, kind: input, shape index: {}]   ;;  %s1891_s1 = inlined_call_operand.hbm [shape: f32[32,128], index: 1, kind: input, shape index: {}]   ;;  %s1892_s2 = inlined_call_operand.hbm [shape: f32[32,32], index: 2, kind: input, shape index: {}]   ;;  %s1893_s3 = inlined_call_operand.vmem [shape: f32[1,32], index: 3, kind: input, shape index: {}]   ;;  %s1894_s4 = inlined_call_operand.hbm [shape: f32[32,128], index: 4, kind: input, shape index: {}]   ;;  %s1895_s5 = inlined_call_operand.vmem [shape: f32[1,128], index: 5, kind: input, shape index: {}]   ;;  %s1896_s6 = inlined_call_operand.hbm [shape: f32[16,128], index: 6, kind: output, shape index: {}]  }
   0x1   :  { %12 = vsyncpa [#allocation7], 0 }
   0x2   :  { %13 = vsyncpa [#allocation10], 0 }
   0x3   :  { %14 = vsyncpa [#allocation5], 0  ;;  %s1611_s21 = smov [#allocation6]   ;;  %s1612_s23 = smov [#allocation3]  }
   0x4   :  { %s32_s22 = sshll.u32 %s1611_s21, 4  ;;  %s20_s24 = sshll.u32 %s1612_s23, 4  ;;  %s33_s22 = int_to_ptr.vmem [resolvable:$true] %s32_s22  ;;  %s1658_s24 = int_to_ptr.vmem [resolvable:$true] %s20_s24 }
   0x5   :  { %s1493_s27 = scalar_lea.hbm %s1891_s1, 512 }
   0x6   :  { %p1494_p0 = scmp.ne.s32.totalorder %s1891_s1, %s1493_s27  ;;  %p1497_p1 = scmp.lt.u32.totalorder %s1493_s27, %s1891_s1 }
   0x8   :  { %p1499_p2 = pnand %p1497_p1, %p1494_p0 }
   0xa   :  { %1502 = shalt.err (!%p1499_p2)
}
   0xb   :  { %s1503_s8 = scalar_lea.vmem %s33_s22, 512  ;;  %p1508_p4 = scmp.lt.s32.totalorder %s33_s22, %s33_s22 }
   0xc   :  { %p1504_p3 = scmp.ne.s32.totalorder %s33_s22, %s1503_s8  ;;  %p1509_p5 = scmp.lt.s32.totalorder %s1503_s8, %s1503_s8 }
   0xe   :  { %p1510_p6 = por %p1509_p5, %p1508_p4 }
  0x10   :  { %p1511_p7 = pnand %p1510_p6, %p1504_p3 }
  0x12   :  { %1514 = shalt.err (!%p1511_p7)
}
  0x13   :  { %s1613_s9 = smov 128   ;;  %s1614_s10 = smov 8  }
  0x14   :  { %38 = dma.hbm_to_vmem [thread:$0]  %s1891_s1, 512, %s33_s22, [#allocation7], %s1613_s9, %s1613_s9, %s1614_s10  }
  0x15   :  { %s1515_s15 = scalar_lea.hbm %s1890_s0, 256 }
  0x16   :  { %p1516_p8 = scmp.ne.s32.totalorder %s1890_s0, %s1515_s15  ;;  %p1519_p9 = scmp.lt.u32.totalorder %s1515_s15, %s1890_s0 }
  0x18   :  { %p1521_p10 = pnand %p1519_p9, %p1516_p8 }
  0x1a   :  { %1524 = shalt.err (!%p1521_p10)
}
  0x1b   :  { %s1525_s20 = scalar_lea.vmem %s1658_s24, 256  ;;  %p1530_p12 = scmp.lt.s32.totalorder %s1658_s24, %s1658_s24 }
  0x1c   :  { %p1526_p11 = scmp.ne.s32.totalorder %s1658_s24, %s1525_s20  ;;  %p1531_p13 = scmp.lt.s32.totalorder %s1525_s20, %s1525_s20 }
  0x1e   :  { %p1532_p0 = por %p1531_p13, %p1530_p12 }
  0x20   :  { %p1533_p1 = pnand %p1532_p0, %p1526_p11 }
  0x22   :  { %1536 = shalt.err (!%p1533_p1)
}
  0x23   :  { %26 = dma.hbm_to_vmem [thread:$0]  %s1890_s0, 256, %s1658_s24, [#allocation4], %s1613_s9, %s1613_s9, %s1614_s10  }
  0x24   :  { %s1615_s22 = smov [#allocation8]   ;;  %s1616_s25 = smov [#allocation9]  }
  0x25   :  { %s44_s23 = sshll.u32 %s1615_s22, 4  ;;  %s58_s26 = sshll.u32 %s1616_s25, 4  ;;  %s45_s23 = int_to_ptr.vmem [resolvable:$true] %s44_s23  ;;  %s1695_s26 = int_to_ptr.vmem [resolvable:$true] %s58_s26 }
  0x26   :  { %s1537_s29 = scalar_lea.hbm %s1892_s2, 512 }
  0x27   :  { %p1538_p2 = scmp.ne.s32.totalorder %s1892_s2, %s1537_s29  ;;  %p1541_p3 = scmp.lt.u32.totalorder %s1537_s29, %s1892_s2 }
  0x29   :  { %p1543_p4 = pnand %p1541_p3, %p1538_p2 }
  0x2b   :  { %1546 = shalt.err (!%p1543_p4)
}
  0x2c   :  { %s1547_s0 = scalar_lea.vmem %s45_s23, 512  ;;  %p1552_p6 = scmp.lt.s32.totalorder %s45_s23, %s45_s23 }
  0x2d   :  { %p1548_p5 = scmp.ne.s32.totalorder %s45_s23, %s1547_s0  ;;  %p1553_p7 = scmp.lt.s32.totalorder %s1547_s0, %s1547_s0 }
  0x2f   :  { %p1554_p8 = por %p1553_p7, %p1552_p6 }
  0x31   :  { %p1555_p9 = pnand %p1554_p8, %p1548_p5 }
  0x33   :  { %1558 = shalt.err (!%p1555_p9)
}
  0x34   :  { %50 = dma.hbm_to_vmem [thread:$0]  %s1892_s2, 512, %s45_s23, [#allocation7], %s1613_s9, %s1613_s9, %s1614_s10  }
  0x35   :  { %s1559_s15 = scalar_lea.hbm %s1894_s4, 512 }
  0x36   :  { %p1560_p10 = scmp.ne.s32.totalorder %s1894_s4, %s1559_s15  ;;  %p1563_p11 = scmp.lt.u32.totalorder %s1559_s15, %s1894_s4 }
  0x38   :  { %p1565_p12 = pnand %p1563_p11, %p1560_p10 }
  0x3a   :  { %1568 = shalt.err (!%p1565_p12)
}
  0x3b   :  { %s1569_s20 = scalar_lea.vmem %s1695_s26, 512  ;;  %p1574_p0 = scmp.lt.s32.totalorder %s1695_s26, %s1695_s26 }
  0x3c   :  { %p1570_p13 = scmp.ne.s32.totalorder %s1695_s26, %s1569_s20  ;;  %p1575_p1 = scmp.lt.s32.totalorder %s1569_s20, %s1569_s20 }
  0x3e   :  { %p1576_p2 = por %p1575_p1, %p1574_p0 }
  0x40   :  { %p1577_p3 = pnand %p1576_p2, %p1570_p13 }
  0x42   :  { %1580 = shalt.err (!%p1577_p3)
}
  0x43   :  { %64 = dma.hbm_to_vmem [thread:$0]  %s1894_s4, 512, %s1695_s26, [#allocation10], %s1613_s9, %s1613_s9, %s1614_s10  }
  0x44   :  { %1603 = dma.done.wait [#allocation4], 256  }
  0x45   :  { %1604 = vsyncadd [#allocation4], 4294967040 }
  0x46   :  { %1605 = dma.done.wait [#allocation7], 1024  }
  0x47   :  { %1606 = vsyncadd [#allocation7], 4294966272 }
  0x48   :  { %1607 = dma.done.wait [#allocation10], 512  }
  0x49   :  { %1608 = vsyncadd [#allocation10], 4294966784  ;;  %v1617_v0 = vmov 0.0|0.0   ;;  %vm1618_vm0 = vmmov 0   ;;  %v1619_v1 = vmov 0.0   ;;  %v79_v2 = vld [vmem:[#allocation6] sm:$0xff] }
  0x4a   :  { %1369 = vmatprep.subr.bf16.mxu0 %v1617_v0  ;;  %1267 = vmatprep.mubr.msk.f32.mxu0 %vm1618_vm0, %v1619_v1  ;;  %v80_v3 = vld [vmem:[#allocation6 + $0x8] sm:$0xff]  ;;  %v81_v4 = vld [vmem:[#allocation6 + $0x10] sm:$0xff]  ;;  %v82_v6 = vld [vmem:[#allocation6 + $0x18] sm:$0xff]  ;;  %s1620_s4 = smov 64   ;;  %s1621_s21 = smov 32   ;;  %vm189_vm1 = vcmask 254976  }
  0x4b   :  { %1375 = vmatprep.subr.bf16.mxu1 %v1617_v0  ;;  %1278 = vmatprep.mubr.msk.f32.mxu1 %vm1618_vm0, %v1619_v1  ;;  %v1738_v5 = vpack.c.bf16 %v80_v3, %v79_v2  ;;  %v1741_v7 = vpack.c.bf16 %v82_v6, %v81_v4  ;;  %v1757_v8 = vld [vmem:[#allocation3] sm:$0xff]  ;;  %vm85_vm2 = vcmask 261120   ;;  %vm299_vm3 = vcmask 257026   ;;  %s1622_s27 = smov [#allocation11]  }
  0x4c   :  { %vm525_vm4 = vcmask 261126   ;;  %vm412_vm5 = vcmask 259076   ;;  %s1164_s28 = sshll.u32 %s1622_s27, 4  ;;  %s1165_s28 = int_to_ptr.vmem [resolvable:$true] %s1164_s28 }
  0x4d   :  { %1371 = vmatpush3.bf16.msra.mxu0 %v1738_v5  ;;  %1377 = vmatpush3.bf16.msra.mxu1 %v1738_v5  ;;  %p1586_p5 = scmp.lt.s32.totalorder %s1165_s28, %s1165_s28 }
  0x4e   :  { %1372 = vmatprep.subr.bf16.mxu0 %v1617_v0  ;;  %1378 = vmatprep.subr.bf16.mxu1 %v1617_v0 }
  0x51   :  { %1374 = vmatpush3.bf16.msra.mxu0 %v1741_v7  ;;  %1380 = vmatpush3.bf16.msra.mxu1 %v1741_v7 }
  0x52   :  { %1381 = vmatprep.subr.bf16.mxu0 %v1617_v0  ;;  %1387 = vmatprep.subr.bf16.mxu1 %v1617_v0 }
  0x54   :  { %1268 = vmatmul.mubr.f32.vlgmr.msra.gmra.mrb[0].mxu0 %v1619_v1 }
  0x55   :  { %1383 = vmatpush3.bf16.msra.mxu0 %v1738_v5  ;;  %1289 = vmatprep.mubr.msk.f32.mxu0 %vm1618_vm0, %v1619_v1 }
  0x56   :  { %1384 = vmatprep.subr.bf16.mxu0 %v1617_v0 }
  0x59   :  { %1386 = vmatpush3.bf16.msra.mxu0 %v1741_v7 }
  0x5a   :  { %1393 = vmatprep.subr.bf16.mxu0 %v1617_v0 }
 0x127   :  { %v155_v9 = vpop.f32.mrb[0].mxu0 }
 0x128   :  { %v159_v10 = vadd.f32 %v155_v9, %v1757_v8  ;;  %v1269_v11 = vpop.f32.mrb[1].mxu0 }
 0x12a   :  { %v1178_v12 = vmul.f32 -1.442695, %v159_v10 }
 0x12c   :  { %1445 = vpow2.f32 %v1178_v12 }
 0x136   :  { %v1446_v13 = vpop.eup %1445 }
 0x137   :  { %v163_v14 = vadd.f32 1.0, %v1446_v13 }
 0x139   :  { %1447 = vrcp.f32 %v163_v14 }
 0x143   :  { %v1448_v15 = vpop.eup %1447 }
 0x144   :  { %v166_v16 = vmul.f32 2.0, %v1448_v15  ;;  %v168_v20 = vmul.f32 0.0, %v1448_v15 }
 0x146   :  { %v1179_v17 = vadd.f32 -1.0, %v166_v16 }
 0x148   :  { %170 = vrot.lane.b32.xlu0 %v1179_v17, %s1620_s4 }
 0x1ba   :  { %v171_v18 = vpop.permute.xlu0 %170 }
 0x1bb   :  { %v173_v19 = vmul.f32 %v1448_v15, %v171_v18 }
 0x1bd   :  { %175 = vrot.lane.b32.xlu0 %v173_v19, %s1621_s21 }
 0x22f   :  { %v176_v21 = vpop.permute.xlu0 %175 }
 0x230   :  { %v178_v22 = vadd.f32 %v176_v21, %v168_v20 }
 0x232   :  { %1449 = vtanh.f32 %v178_v22  ;;  %v276_v39 = vrot.slane %v178_v22, 6 }
 0x23c   :  { %v1450_v23 = vpop.eup %1449 }
 0x23d   :  { %181 = vrot.lane.b32.xlu1 %v1450_v23, %s1620_s4 }
 0x2af   :  { %v182_v24 = vpop.permute.xlu1 %181 }
 0x2b0   :  { %v184_v25 = vmul.f32 %v1448_v15, %v182_v24 }
 0x2b2   :  { %186 = vrot.lane.b32.xlu1 %v184_v25, %s1621_s21 }
 0x324   :  { %v187_v26 = vpop.permute.xlu1 %186 }
 0x325   :  { %190 = vst.msk [vmem:[#allocation2] sm:$0x3] %vm189_vm1, %v187_v26  ;;  %1279 = vmatmul.mubr.msk.f32.vlgmr.msra.gmra.mrb[0].mxu1 %vm85_vm2, %v187_v26 }
 0x326   :  { %1389 = vmatpush3.bf16.msra.mxu1 %v1738_v5  ;;  %1300 = vmatprep.mubr.msk.f32.mxu1 %vm1618_vm0, %v1619_v1 }
 0x327   :  { %1390 = vmatprep.subr.bf16.mxu1 %v1617_v0 }
 0x32a   :  { %1392 = vmatpush3.bf16.msra.mxu1 %v1741_v7 }
 0x32b   :  { %1399 = vmatprep.subr.bf16.mxu1 %v1617_v0 }
 0x3f8   :  { %v259_v27 = vpop.f32.mrb[0].mxu1 }
 0x3f9   :  { %v264_v28 = vrot.slane %v259_v27, 6  ;;  %v1280_v29 = vpop.f32.mrb[1].mxu1 }
 0x3fb   :  { %v266_v30 = vadd.f32 %v264_v28, %v1757_v8 }
 0x3fd   :  { %v1181_v31 = vmul.f32 -1.442695, %v266_v30  ;;  %v1816_v30 = vld [vmem:[#allocation3 + $0x8] sm:$0xff] }
 0x3ff   :  { %1451 = vpow2.f32 %v1181_v31 }
 0x409   :  { %v1452_v32 = vpop.eup %1451 }
 0x40a   :  { %v270_v33 = vadd.f32 1.0, %v1452_v32 }
 0x40c   :  { %1453 = vrcp.f32 %v270_v33 }
 0x416   :  { %v1454_v34 = vpop.eup %1453 }
 0x417   :  { %v273_v35 = vmul.f32 2.0, %v1454_v34  ;;  %v278_v40 = vmul.f32 %v1454_v34, %v276_v39 }
 0x419   :  { %v1182_v36 = vadd.f32 -1.0, %v273_v35 }
 0x41b   :  { %280 = vrot.lane.b32.xlu0 %v1182_v36, %s1620_s4 }
 0x48d   :  { %v281_v37 = vpop.permute.xlu0 %280 }
 0x48e   :  { %v283_v38 = vmul.f32 %v1454_v34, %v281_v37 }
 0x490   :  { %285 = vrot.lane.b32.xlu1 %v283_v38, %s1621_s21 }
 0x502   :  { %v286_v41 = vpop.permute.xlu1 %285 }
 0x503   :  { %v288_v42 = vadd.f32 %v286_v41, %v278_v40 }
 0x505   :  { %1455 = vtanh.f32 %v288_v42  ;;  %v389_v60 = vrot.slane %v288_v42, 6 }
 0x50f   :  { %v1456_v43 = vpop.eup %1455 }
 0x510   :  { %291 = vrot.lane.b32.xlu0 %v1456_v43, %s1620_s4 }
 0x582   :  { %v292_v44 = vpop.permute.xlu0 %291 }
 0x583   :  { %v1776_v45 = vmul.f32 %v1454_v34, %v292_v44 }
 0x585   :  { %v301_v46 = vrot.slane %v1776_v45, 2 }
 0x587   :  { %302 = vrot.lane.b32.xlu1 %v301_v46, %s1621_s21 }
 0x5f9   :  { %v303_v47 = vpop.permute.xlu1 %302 }
 0x5fa   :  { %1290 = vmatmul.mubr.msk.f32.vlgmr.msra.gmra.mrb[2].mxu0 %vm85_vm2, %v303_v47 }
 0x5fb   :  { %1395 = vmatpush3.bf16.msra.mxu0 %v1738_v5  ;;  %1311 = vmatprep.mubr.msk.f32.mxu0 %vm1618_vm0, %v1619_v1 }
 0x5fc   :  { %1396 = vmatprep.subr.bf16.mxu0 %v1617_v0 }
 0x5ff   :  { %1398 = vmatpush3.bf16.msra.mxu0 %v1741_v7 }
 0x600   :  { %1405 = vmatprep.subr.bf16.mxu0 %v1617_v0 }
 0x6cd   :  { %v372_v48 = vpop.f32.mrb[2].mxu0 }
 0x6ce   :  { %v377_v49 = vrot.slane %v372_v48, 4  ;;  %v1291_v50 = vpop.f32.mrb[3].mxu0 }
 0x6d0   :  { %v379_v51 = vadd.f32 %v377_v49, %v1757_v8 }
 0x6d2   :  { %v1184_v52 = vmul.f32 -1.442695, %v379_v51 }
 0x6d4   :  { %1457 = vpow2.f32 %v1184_v52 }
 0x6de   :  { %v1458_v53 = vpop.eup %1457 }
 0x6df   :  { %v383_v54 = vadd.f32 1.0, %v1458_v53 }
 0x6e1   :  { %1459 = vrcp.f32 %v383_v54 }
 0x6eb   :  { %v1460_v55 = vpop.eup %1459 }
 0x6ec   :  { %v386_v56 = vmul.f32 2.0, %v1460_v55  ;;  %v391_v61 = vmul.f32 %v1460_v55, %v389_v60 }
 0x6ee   :  { %v1185_v57 = vadd.f32 -1.0, %v386_v56 }
 0x6f0   :  { %393 = vrot.lane.b32.xlu0 %v1185_v57, %s1620_s4 }
 0x762   :  { %v394_v58 = vpop.permute.xlu0 %393 }
 0x763   :  { %v396_v59 = vmul.f32 %v1460_v55, %v394_v58 }
 0x765   :  { %398 = vrot.lane.b32.xlu1 %v396_v59, %s1621_s21 }
 0x7d7   :  { %v399_v62 = vpop.permute.xlu1 %398 }
 0x7d8   :  { %v401_v63 = vadd.f32 %v399_v62, %v391_v61 }
 0x7da   :  { %1461 = vtanh.f32 %v401_v63  ;;  %v502_v22 = vrot.slane %v401_v63, 6 }
 0x7e4   :  { %v1462_v2 = vpop.eup %1461 }
 0x7e5   :  { %404 = vrot.lane.b32.xlu0 %v1462_v2, %s1620_s4 }
 0x857   :  { %v405_v3 = vpop.permute.xlu0 %404 }
 0x858   :  { %v1791_v4 = vmul.f32 %v1460_v55, %v405_v3 }
 0x85a   :  { %v414_v6 = vrot.slane %v1791_v4, 4 }
 0x85c   :  { %415 = vrot.lane.b32.xlu1 %v414_v6, %s1621_s21 }
 0x8ce   :  { %v416_v9 = vpop.permute.xlu1 %415 }
 0x8cf   :  { %1301 = vmatmul.mubr.msk.f32.vlgmr.msra.gmra.mrb[2].mxu1 %vm85_vm2, %v416_v9 }
 0x8d0   :  { %1401 = vmatpush3.bf16.msra.mxu1 %v1738_v5  ;;  %1322 = vmatprep.mubr.msk.f32.mxu1 %vm1618_vm0, %v1619_v1 }
 0x8d1   :  { %1402 = vmatprep.subr.bf16.mxu1 %v1617_v0 }
 0x8d4   :  { %1404 = vmatpush3.bf16.msra.mxu1 %v1741_v7 }
 0x8d5   :  { %1411 = vmatprep.subr.bf16.mxu1 %v1617_v0 }
 0x9a2   :  { %v485_v10 = vpop.f32.mrb[2].mxu1 }
 0x9a3   :  { %v490_v11 = vrot.slane %v485_v10, 2  ;;  %v1302_v12 = vpop.f32.mrb[3].mxu1 }
 0x9a5   :  { %v492_v13 = vadd.f32 %v490_v11, %v1757_v8 }
 0x9a7   :  { %v1187_v14 = vmul.f32 -1.442695, %v492_v13 }
 0x9a9   :  { %1463 = vpow2.f32 %v1187_v14 }
 0x9b3   :  { %v1464_v15 = vpop.eup %1463 }
 0x9b4   :  { %v496_v16 = vadd.f32 1.0, %v1464_v15 }
 0x9b6   :  { %1465 = vrcp.f32 %v496_v16 }
 0x9c0   :  { %v1466_v17 = vpop.eup %1465 }
 0x9c1   :  { %v499_v18 = vmul.f32 2.0, %v1466_v17  ;;  %v504_v23 = vmul.f32 %v1466_v17, %v502_v22 }
 0x9c3   :  { %v1188_v19 = vadd.f32 -1.0, %v499_v18 }
 0x9c5   :  { %506 = vrot.lane.b32.xlu0 %v1188_v19, %s1620_s4 }
 0xa37   :  { %v507_v20 = vpop.permute.xlu0 %506 }
 0xa38   :  { %v509_v21 = vmul.f32 %v1466_v17, %v507_v20 }
 0xa3a   :  { %511 = vrot.lane.b32.xlu1 %v509_v21, %s1621_s21 }
 0xaac   :  { %v512_v24 = vpop.permute.xlu1 %511 }
 0xaad   :  { %v514_v25 = vadd.f32 %v512_v24, %v504_v23 }
 0xaaf   :  { %1467 = vtanh.f32 %v514_v25  ;;  %v612_v42 = vrot.slane %v514_v25, 6 }
 0xab9   :  { %v1468_v8 = vpop.eup %1467 }
 0xaba   :  { %517 = vrot.lane.b32.xlu0 %v1468_v8, %s1620_s4 }
 0xb2c   :  { %v518_v26 = vpop.permute.xlu0 %517 }
 0xb2d   :  { %v1806_v27 = vmul.f32 %v1466_v17, %v518_v26 }
 0xb2f   :  { %v527_v28 = vrot.slane %v1806_v27, 6 }
 0xb31   :  { %528 = vrot.lane.b32.xlu1 %v527_v28, %s1621_s21 }
 0xba3   :  { %v529_v29 = vpop.permute.xlu1 %528 }
 0xba4   :  { %1312 = vmatmul.mubr.msk.f32.vlgmr.msra.gmra.mrb[4].mxu0 %vm85_vm2, %v529_v29 }
 0xba5   :  { %1407 = vmatpush3.bf16.msra.mxu0 %v1738_v5  ;;  %1333 = vmatprep.mubr.msk.f32.mxu0 %vm1618_vm0, %v1619_v1 }
 0xba6   :  { %1408 = vmatprep.subr.bf16.mxu0 %v1617_v0 }
 0xba9   :  { %1410 = vmatpush3.bf16.msra.mxu0 %v1741_v7 }
 0xc77   :  { %v598_v31 = vpop.f32.mrb[4].mxu0 }
 0xc78   :  { %v602_v32 = vadd.f32 %v598_v31, %v1816_v30  ;;  %v1313_v33 = vpop.f32.mrb[5].mxu0 }
 0xc7a   :  { %v1190_v34 = vmul.f32 -1.442695, %v602_v32 }
 0xc7c   :  { %1469 = vpow2.f32 %v1190_v34 }
 0xc86   :  { %v1470_v35 = vpop.eup %1469 }
 0xc87   :  { %v606_v36 = vadd.f32 1.0, %v1470_v35 }
 0xc89   :  { %1471 = vrcp.f32 %v606_v36 }
 0xc93   :  { %v1472_v37 = vpop.eup %1471 }
 0xc94   :  { %v609_v38 = vmul.f32 2.0, %v1472_v37  ;;  %v614_v43 = vmul.f32 %v1472_v37, %v612_v42 }
 0xc96   :  { %v1191_v39 = vadd.f32 -1.0, %v609_v38 }
 0xc98   :  { %616 = vrot.lane.b32.xlu0 %v1191_v39, %s1620_s4 }
 0xd0a   :  { %v617_v40 = vpop.permute.xlu0 %616 }
 0xd0b   :  { %v619_v41 = vmul.f32 %v1472_v37, %v617_v40 }
 0xd0d   :  { %621 = vrot.lane.b32.xlu1 %v619_v41, %s1621_s21 }
 0xd7f   :  { %v622_v44 = vpop.permute.xlu1 %621 }
 0xd80   :  { %v624_v46 = vadd.f32 %v622_v44, %v614_v43 }
 0xd82   :  { %1473 = vtanh.f32 %v624_v46 }
 0xd8c   :  { %v1474_v47 = vpop.eup %1473 }
 0xd8d   :  { %627 = vrot.lane.b32.xlu0 %v1474_v47, %s1620_s4 }
 0xdff   :  { %v628_v48 = vpop.permute.xlu0 %627 }
 0xe00   :  { %v630_v49 = vmul.f32 %v1472_v37, %v628_v48 }
 0xe02   :  { %632 = vrot.lane.b32.xlu1 %v630_v49, %s1621_s21 }
 0xe74   :  { %v633_v50 = vpop.permute.xlu1 %632 }
 0xe75   :  { %635 = vst.msk [vmem:[#allocation2 + $0x8] sm:$0x3] %vm189_vm1, %v633_v50  ;;  %1323 = vmatmul.mubr.msk.f32.vlgmr.msra.gmra.mrb[4].mxu1 %vm85_vm2, %v633_v50 }
 0xe76   :  { %1413 = vmatpush3.bf16.msra.mxu1 %v1738_v5  ;;  %1344 = vmatprep.mubr.msk.f32.mxu1 %vm1618_vm0, %v1619_v1 }
 0xe77   :  { %1414 = vmatprep.subr.bf16.mxu1 %v1617_v0  ;;  %v721_v0 = vrot.slane %v624_v46, 6 }
 0xe7a   :  { %1416 = vmatpush3.bf16.msra.mxu1 %v1741_v7 }
 0xf48   :  { %v704_v51 = vpop.f32.mrb[4].mxu1 }
 0xf49   :  { %v709_v52 = vrot.slane %v704_v51, 6  ;;  %v1324_v53 = vpop.f32.mrb[5].mxu1  ;;  %v972_v51 = vld [vmem:[#allocation8 + $0x8] sm:$0xff] }
 0xf4a   :  { %v973_v53 = vld [vmem:[#allocation8 + $0x10] sm:$0xff] }
 0xf4b   :  { %v711_v54 = vadd.f32 %v709_v52, %v1816_v30 }
 0xf4d   :  { %v1193_v55 = vmul.f32 -1.442695, %v711_v54  ;;  %v974_v54 = vld [vmem:[#allocation8 + $0x18] sm:$0xff] }
 0xf4f   :  { %1475 = vpow2.f32 %v1193_v55  ;;  %v1421_v55 = vpack.c.bf16 %v974_v54, %v973_v53 }
 0xf59   :  { %v1476_v56 = vpop.eup %1475 }
 0xf5a   :  { %v715_v57 = vadd.f32 1.0, %v1476_v56  ;;  %v1065_v56 = vld [vmem:[#allocation9] sm:$0xff] }
 0xf5c   :  { %1477 = vrcp.f32 %v715_v57  ;;  %v1066_v57 = vld [vmem:[#allocation9 + $0x8] sm:$0xff] }
 0xf66   :  { %v1478_v58 = vpop.eup %1477 }
 0xf67   :  { %v718_v59 = vmul.f32 2.0, %v1478_v58  ;;  %v723_v7 = vmul.f32 %v1478_v58, %v721_v0 }
 0xf69   :  { %v1194_v5 = vadd.f32 -1.0, %v718_v59 }
 0xf6b   :  { %725 = vrot.lane.b32.xlu0 %v1194_v5, %s1620_s4 }
 0xfdd   :  { %v726_v1 = vpop.permute.xlu0 %725 }
 0xfde   :  { %v728_v60 = vmul.f32 %v1478_v58, %v726_v1 }
 0xfe0   :  { %730 = vrot.lane.b32.xlu1 %v728_v60, %s1621_s21 }
0x1052   :  { %v731_v61 = vpop.permute.xlu1 %730 }
0x1053   :  { %v733_v62 = vadd.f32 %v731_v61, %v723_v7  ;;  %v1067_v61 = vld [vmem:[#allocation9 + $0x10] sm:$0xff] }
0x1055   :  { %1479 = vtanh.f32 %v733_v62  ;;  %v833_v22 = vrot.slane %v733_v62, 6  ;;  %v1068_v62 = vld [vmem:[#allocation9 + $0x18] sm:$0xff] }
0x105f   :  { %v1480_v63 = vpop.eup %1479 }
0x1060   :  { %736 = vrot.lane.b32.xlu0 %v1480_v63, %s1620_s4  ;;  %v1429_v63 = vpack.c.bf16 %v1068_v62, %v1067_v61 }
0x10d2   :  { %v737_v2 = vpop.permute.xlu0 %736 }
0x10d3   :  { %v1834_v3 = vmul.f32 %v1478_v58, %v737_v2  ;;  %v1425_v58 = vpack.c.bf16 %v1066_v57, %v1065_v56  ;;  %v1201_v2 = vld [vmem:[%s1893_s3] ss:$0 sm:$0xff]  ;;  %s1581_s3 = scalar_lea.vmem %s1165_s28, 256 }
0x10d4   :  { %p1582_p4 = scmp.ne.s32.totalorder %s1165_s28, %s1581_s3  ;;  %p1587_p6 = scmp.lt.s32.totalorder %s1581_s3, %s1581_s3 }
0x10d5   :  { %v745_v6 = vrot.slane %v1834_v3, 2  ;;  %1426 = vmatprep.subr.bf16.mxu1 %v1425_v58 }
0x10d6   :  { %p1588_p7 = por %p1587_p6, %p1586_p5 }
0x10d7   :  { %746 = vrot.lane.b32.xlu1 %v745_v6, %s1621_s21 }
0x10d8   :  { %p1589_p8 = pnand %p1588_p7, %p1582_p4 }
0x1149   :  { %v747_v9 = vpop.permute.xlu1 %746 }
0x114a   :  { %1334 = vmatmul.mubr.msk.f32.vlgmr.msra.gmra.mrb[6].mxu0 %vm85_vm2, %v747_v9 }
0x121d   :  { %v816_v10 = vpop.f32.mrb[6].mxu0 }
0x121e   :  { %v821_v11 = vrot.slane %v816_v10, 4  ;;  %v1335_v12 = vpop.f32.mrb[7].mxu0 }
0x1220   :  { %v823_v13 = vadd.f32 %v821_v11, %v1816_v30 }
0x1222   :  { %v1196_v14 = vmul.f32 -1.442695, %v823_v13  ;;  %v1204_v13 = vld [vmem:[%s1895_s5] ss:$0 sm:$0xff] }
0x1224   :  { %1481 = vpow2.f32 %v1196_v14 }
0x122e   :  { %v1482_v15 = vpop.eup %1481 }
0x122f   :  { %v827_v16 = vadd.f32 1.0, %v1482_v15 }
0x1231   :  { %1483 = vrcp.f32 %v827_v16 }
0x123b   :  { %v1484_v17 = vpop.eup %1483 }
0x123c   :  { %v830_v18 = vmul.f32 2.0, %v1484_v17  ;;  %v835_v23 = vmul.f32 %v1484_v17, %v833_v22 }
0x123e   :  { %v1197_v19 = vadd.f32 -1.0, %v830_v18 }
0x1240   :  { %837 = vrot.lane.b32.xlu0 %v1197_v19, %s1620_s4 }
0x12b2   :  { %v838_v20 = vpop.permute.xlu0 %837 }
0x12b3   :  { %v840_v21 = vmul.f32 %v1484_v17, %v838_v20 }
0x12b5   :  { %842 = vrot.lane.b32.xlu1 %v840_v21, %s1621_s21 }
0x1327   :  { %v843_v24 = vpop.permute.xlu1 %842 }
0x1328   :  { %v845_v25 = vadd.f32 %v843_v24, %v835_v23 }
0x132a   :  { %1485 = vtanh.f32 %v845_v25 }
0x1334   :  { %v1486_v8 = vpop.eup %1485 }
0x1335   :  { %848 = vrot.lane.b32.xlu0 %v1486_v8, %s1620_s4 }
0x13a7   :  { %v849_v26 = vpop.permute.xlu0 %848 }
0x13a8   :  { %v851_v28 = vmul.f32 %v1484_v17, %v849_v26 }
0x13aa   :  { %v857_v29 = vrot.slane %v851_v28, 4 }
0x13ac   :  { %858 = vrot.lane.b32.xlu1 %v857_v29, %s1621_s21 }
0x141e   :  { %v859_v31 = vpop.permute.xlu1 %858 }
0x141f   :  { %1345 = vmatmul.mubr.msk.f32.vlgmr.msra.gmra.mrb[6].mxu1 %vm85_vm2, %v859_v31 }
0x1420   :  { %1428 = vmatpush3.bf16.msra.mxu1 %v1425_v58 }
0x1421   :  { %1430 = vmatprep.subr.bf16.mxu1 %v1429_v63 }
0x1424   :  { %1432 = vmatpush3.bf16.msra.mxu1 %v1429_v63 }
0x14f2   :  { %v928_v32 = vpop.f32.mrb[6].mxu1 }
0x14f3   :  { %v933_v33 = vrot.slane %v928_v32, 2  ;;  %v1346_v34 = vpop.f32.mrb[7].mxu1 }
0x14f5   :  { %v935_v35 = vadd.f32 %v933_v33, %v1816_v30  ;;  %v945_v30 = vrot.slane %v845_v25, 6 }
0x14f7   :  { %v1199_v36 = vmul.f32 -1.442695, %v935_v35 }
0x14f9   :  { %1487 = vpow2.f32 %v1199_v36 }
0x1503   :  { %v1488_v37 = vpop.eup %1487 }
0x1504   :  { %v939_v38 = vadd.f32 1.0, %v1488_v37 }
0x1506   :  { %1489 = vrcp.f32 %v939_v38 }
0x1510   :  { %v1490_v39 = vpop.eup %1489 }
0x1511   :  { %v942_v40 = vmul.f32 2.0, %v1490_v39  ;;  %v947_v44 = vmul.f32 %v1490_v39, %v945_v30 }
0x1513   :  { %v1200_v41 = vadd.f32 -1.0, %v942_v40 }
0x1515   :  { %949 = vrot.lane.b32.xlu0 %v1200_v41, %s1620_s4 }
0x1587   :  { %v950_v42 = vpop.permute.xlu0 %949 }
0x1588   :  { %v952_v43 = vmul.f32 %v1490_v39, %v950_v42 }
0x158a   :  { %954 = vrot.lane.b32.xlu1 %v952_v43, %s1621_s21 }
0x158e   :  { %296 = vrot.lane.b32.xlu1 %v1776_v45, %s1621_s21 }
0x1592   :  { %522 = vrot.lane.b32.xlu1 %v1806_v27, %s1621_s21  ;;  %v971_v27 = vld [vmem:[#allocation8] sm:$0xff] }
0x1593   :  { %v1417_v52 = vpack.c.bf16 %v972_v51, %v971_v27 }
0x1595   :  { %1418 = vmatprep.subr.bf16.mxu0 %v1417_v52 }
0x1596   :  { %853 = vrot.lane.b32.xlu1 %v851_v28, %s1621_s21  ;;  %1420 = vmatpush3.bf16.msra.mxu0 %v1417_v52 }
0x1597   :  { %1422 = vmatprep.subr.bf16.mxu0 %v1421_v55 }
0x159a   :  { %1424 = vmatpush3.bf16.msra.mxu0 %v1421_v55 }
0x15fc   :  { %v955_v46 = vpop.permute.xlu1 %954 }
0x15fd   :  { %v957_v47 = vadd.f32 %v955_v46, %v947_v44 }
0x15ff   :  { %1491 = vtanh.f32 %v957_v47 }
0x1600   :  { %v297_v48 = vpop.permute.xlu1 %296 }
0x1601   :  { %300 = vst.msk [vmem:[#allocation2] sm:$0xc] %vm299_vm3, %v297_v48 }
0x1604   :  { %v523_v49 = vpop.permute.xlu1 %522 }
0x1605   :  { %526 = vst.msk [vmem:[#allocation2] sm:$0xc0] %vm525_vm4, %v523_v49 }
0x1608   :  { %v854_v45 = vpop.permute.xlu1 %853 }
0x1609   :  { %v1492_v50 = vpop.eup %1491  ;;  %856 = vst.msk [vmem:[#allocation2 + $0x8] sm:$0x30] %vm412_vm5, %v854_v45 }
0x160a   :  { %960 = vrot.lane.b32.xlu0 %v1492_v50, %s1620_s4 }
0x160e   :  { %409 = vrot.lane.b32.xlu0 %v1791_v4, %s1621_s21 }
0x1612   :  { %741 = vrot.lane.b32.xlu0 %v1834_v3, %s1621_s21 }
0x167c   :  { %v961_v59 = vpop.permute.xlu0 %960 }
0x167d   :  { %v963_v5 = vmul.f32 %v1490_v39, %v961_v59 }
0x167f   :  { %965 = vrot.lane.b32.xlu0 %v963_v5, %s1621_s21 }
0x1680   :  { %v410_v4 = vpop.permute.xlu0 %409 }
0x1681   :  { %413 = vst.msk [vmem:[#allocation2] sm:$0x30] %vm412_vm5, %v410_v4 }
0x1684   :  { %v742_v1 = vpop.permute.xlu0 %741 }
0x1685   :  { %744 = vst.msk [vmem:[#allocation2 + $0x8] sm:$0xc] %vm299_vm3, %v742_v1 }
0x1688   :  { %v969_v60 = vld [vmem:[#allocation2] sm:$0xff] }
0x1689   :  { %1355 = vmatprep.mubr.msk.f32.mxu0 %vm85_vm2, %v969_v60 }
0x16f1   :  { %v966_v0 = vpop.permute.xlu0 %965 }
0x16f2   :  { %968 = vst.msk [vmem:[#allocation2 + $0x8] sm:$0xc0] %vm525_vm4, %v966_v0 }
0x16f9   :  { %v970_v7 = vld [vmem:[#allocation2 + $0x8] sm:$0xff] }
0x16fa   :  { %1356 = vmatmul.mubr.msk.f32.vlgmr.msra.gmra.mrb[8].mxu0 %vm85_vm2, %v970_v7 }
0x17cd   :  { %v1357_v3 = vpop.f32.mrb[8].mxu0 }
0x17ce   :  { %v1060_v6 = vadd.f32 %v1357_v3, %v1201_v2  ;;  %v1054_v9 = vpop.f32.mrb[9].mxu0 }
0x17cf   :  { %v1055_v10 = vadd.f32 %v1201_v2, %v1054_v9 }
0x17d0   :  { %v1064_v12 = vmax.f32 %v1060_v6, 0.0 }
0x17d1   :  { %v1063_v11 = vmax.f32 %v1055_v10, 0.0 }
0x17d3   :  { %1366 = vmatprep.mubr.msk.f32.mxu1 %vm85_vm2, %v1063_v11 }
0x17d4   :  { %1367 = vmatmul.mubr.msk.f32.vlgmr.msra.gmra.mrb[8].mxu1 %vm85_vm2, %v1064_v12 }
0x18a7   :  { %v1368_v14 = vpop.f32.mrb[8].mxu1 }
0x18a8   :  { %v1154_v15 = vadd.f32 %v1368_v14, %v1204_v13  ;;  %v1148_v16 = vpop.f32.mrb[9].mxu1 }
0x18a9   :  { %v1149_v17 = vadd.f32 %v1204_v13, %v1148_v16 }
0x18aa   :  { %1158 = vst [vmem:[#allocation11 + $0x8] sm:$0xff] %v1154_v15 }
0x18ab   :  { %1157 = vst [vmem:[#allocation11] sm:$0xff] %v1149_v17 }
0x18ac   :  { %1592 = shalt.err (!%p1589_p8)
}
0x18ad   :  { %s1593_s5 = scalar_lea.hbm %s1896_s6, 256 }
0x18ae   :  { %p1594_p9 = scmp.ne.s32.totalorder %s1896_s6, %s1593_s5  ;;  %p1597_p10 = scmp.lt.u32.totalorder %s1593_s5, %s1896_s6 }
0x18b0   :  { %p1599_p11 = pnand %p1597_p10, %p1594_p9 }
0x18b2   :  { %1602 = shalt.err (!%p1599_p11)
}
0x18b3   :  { %1170 = dma.vmem_to_hbm [thread:$0]  %s1165_s28, 256, %s1896_s6, [#allocation5], %s1613_s9, %s1613_s9, %s1614_s10  }
0x18b4   :  { %1609 = dma.done.wait [#allocation5], 256  }
0x18b5   :  { %1610 = vsyncadd [#allocation5], 4294967040 }
0x18b6   :  { %1174 = vsyncpa [#allocation4], 1 }
0x18b7   :  { %1175 = vsyncpa [#allocation7], 1 }
0x18b8   :  { %1176 = vsyncpa [#allocation10], 1 }
0x18b9   :  { %1177 = vsyncpa [#allocation5], 1 }

</bundles_post_ra>
